<compile_context>
chip_gen: v5e
topology: v5e:2x2
jax: 0.10.0
libtpu: 0.0.40
codegen_flags: <defaults>
</compile_context>

<pallas_src>
import functools

import jax
import jax.numpy as jnp
from jax.experimental import pallas as pl
from jax.experimental.pallas import tpu as pltpu

LANES = 128
SUBLANES = 8
MAX_BLOCK_ROWS = 8192        # 8192 x 128 f32 = 4 MiB per input block
CHUNK_ROWS = 512             # in-kernel sub-slice: 512 x 128 f32 = 256 KiB temporaries
NUM_PARALLEL_CORES = 2       # v7x has 2 TCs; extra axis is a no-op on v5e/v6e
VMEM_LIMIT_BYTES = 32 * 1024 * 1024


def _round_up(x, m):
    return ((x + m - 1) // m) * m


def _ssd_kernel(a_ref, b_ref, o_ref, *, block_rows, chunk_rows, n_chunks,
                tail_rows, blocks_per_core, total_rows, needs_mask):
    """Accumulates sum((a - b)^2) for this core into a resident (1, 8, 128) block."""
    core = pl.program_id(0)
    step = pl.program_id(1)

    @pl.when(step == 0)
    def _():
        o_ref[...] = jnp.zeros_like(o_ref)

    # Global row offset of this block, using the *logical* (unclamped) block id so that
    # padded / clamped duplicate blocks are masked out entirely.
    block_id = core * blocks_per_core + step
    row_base = block_id * block_rows

    def partial_sum(row0, nrows):
        # DMA already happened in the input dtype; cast to f32 on the VPU here.
        av = a_ref[pl.ds(row0, nrows), :].astype(jnp.float32)
        bv = b_ref[pl.ds(row0, nrows), :].astype(jnp.float32)
        d = av - bv
        sq = d * d
        if needs_mask:
            # Select (not multiply) so NaN/Inf garbage in padded rows cannot leak.
            rid = row_base + row0 + jax.lax.broadcasted_iota(jnp.int32, sq.shape, 0)
            sq = jnp.where(rid < total_rows, sq, 0.0)
        # Fold into (8, 128): pure VPU vreg adds, no cross-lane traffic.
        return sq.reshape(nrows // SUBLANES, SUBLANES, LANES).sum(axis=0)

    acc = jnp.zeros((SUBLANES, LANES), jnp.float32)

    if n_chunks > 1:
        def body(ci, carry):
            r0 = pl.multiple_of(ci * chunk_rows, chunk_rows)
            return carry + partial_sum(r0, chunk_rows)
        acc = jax.lax.fori_loop(0, n_chunks, body, acc, unroll=2)
    else:
        acc = acc + partial_sum(0, chunk_rows)

    if tail_rows:
        acc = acc + partial_sum(n_chunks * chunk_rows, tail_rows)

    o_ref[...] += acc[jnp.newaxis]


def _jnp_ssd(a, b):
    """Plain-XLA sum of squared differences (tiny tensors / unaligned sizes)."""
    d = a.astype(jnp.float32) - b.astype(jnp.float32)
    return jnp.sum(d * d)


def sum_squared_diff(a, b):
    """||a - b||_F^2 as a Pallas streaming reduction. Returns an f32 scalar."""
    if a.shape != b.shape:
        raise ValueError(f"shape mismatch: {a.shape} vs {b.shape}")

    n = a.size
    if n == 0:
        return jnp.float32(0.0)

    itemsize = jnp.dtype(a.dtype).itemsize
    rows = n // LANES
    if (n % LANES != 0 or rows < SUBLANES or a.dtype != b.dtype
            or itemsize not in (1, 2, 4)):
        # TODO(synk): element-index-masked kernel path for non-128-multiple sizes.
        return _jnp_ssd(a, b)

    # Packed dtypes need sublane-group multiples of 16 (2B) / 32 (1B) per block.
    sub_mult = SUBLANES * max(1, 4 // itemsize)

    if rows >= MAX_BLOCK_ROWS:
        block_rows = MAX_BLOCK_ROWS
    else:
        block_rows = _round_up(rows, sub_mult)     # single (possibly padded) block
    n_blocks = pl.cdiv(rows, block_rows)

    num_cores = NUM_PARALLEL_CORES if n_blocks >= 2 else 1
    blocks_per_core = pl.cdiv(n_blocks, num_cores)
    # Mask needed whenever the (core-padded) grid covers more rows than exist.
    needs_mask = (num_cores * blocks_per_core * block_rows) != rows

    if block_rows > CHUNK_ROWS:
        chunk_rows = CHUNK_ROWS
        n_chunks = block_rows // CHUNK_ROWS
        tail_rows = block_rows - n_chunks * CHUNK_ROWS   # multiple of sub_mult (>= 8)
    else:
        chunk_rows = block_rows
        n_chunks = 1
        tail_rows = 0

    # Contiguous reshapes only -- no copies, original dtype (half DMA traffic for bf16).
    a2 = a.reshape(rows, LANES)
    b2 = b.reshape(rows, LANES)

    kernel = functools.partial(
        _ssd_kernel,
        block_rows=block_rows, chunk_rows=chunk_rows, n_chunks=n_chunks,
        tail_rows=tail_rows, blocks_per_core=blocks_per_core,
        total_rows=rows, needs_mask=needs_mask,
    )

    def in_idx(c, i):
        # Clamp so padded grid positions never produce an out-of-range block start;
        # their contents are fully masked out in the kernel.
        return (jnp.minimum(c * blocks_per_core + i, n_blocks - 1), 0)

    cost = pl.CostEstimate(
        flops=3 * rows * LANES,
        transcendentals=0,
        bytes_accessed=2 * rows * LANES * itemsize
        + num_cores * SUBLANES * LANES * 4,
    )

    partial = pl.pallas_call(
        kernel,
        out_shape=jax.ShapeDtypeStruct((num_cores, SUBLANES, LANES), jnp.float32),
        grid_spec=pltpu.PrefetchScalarGridSpec(
            num_scalar_prefetch=0,
            grid=(num_cores, blocks_per_core),
            in_specs=[
                pl.BlockSpec((block_rows, LANES), in_idx),
                pl.BlockSpec((block_rows, LANES), in_idx),
            ],
            # Same block per core across the reduction axis -> resident accumulator.
            out_specs=pl.BlockSpec((1, SUBLANES, LANES), lambda c, i: (c, 0, 0)),
        ),
        compiler_params=pltpu.CompilerParams(
            dimension_semantics=("parallel", "arbitrary"),
            vmem_limit_bytes=VMEM_LIMIT_BYTES,
        ),
        cost_estimate=cost,
    )(a2, b2)

    # Final cross-lane reduce of num_cores x 1024 partials: trivial, done in XLA.
    return jnp.sum(partial)


def jacobian_clamping_loss(gz, gz_prime, z, z_prime,
                           lambda_min=1.0, lambda_max=20.0):
    # Generator outputs: large -> Pallas streaming reduction.
    ssd_g = sum_squared_diff(gz, gz_prime)
    # Latent codes: tiny (a few vregs) -> sum_squared_diff falls back to plain jnp,
    # which XLA fuses; a kernel here would be pure launch overhead.
    ssd_z = sum_squared_diff(z, z_prime)

    # Note: like the PyTorch reference, q is Inf/NaN if z == z_prime (no epsilon).
    q = jnp.sqrt(ssd_g) / jnp.sqrt(ssd_z)
    # torch.clamp(q, lambda_max, inf) == max(q, lambda_max);
    # torch.clamp(q, -inf, lambda_min) == min(q, lambda_min).
    l_max = (jnp.maximum(q, lambda_max) - lambda_max) ** 2
    l_min = (jnp.minimum(q, lambda_min) - lambda_min) ** 2
    return l_max + l_min


def _reference_loss(gz, gz_prime, z, z_prime, lambda_min=1.0, lambda_max=20.0):
    q = jnp.linalg.norm((gz - gz_prime).ravel()) / jnp.linalg.norm((z - z_prime).ravel())
    l_max = (jnp.maximum(q, lambda_max) - lambda_max) ** 2
    l_min = (jnp.minimum(q, lambda_min) - lambda_min) ** 2
    return l_max + l_min


if __name__ == "__main__":
    key = jax.random.PRNGKey(0)
    k1, k2, k3, k4 = jax.random.split(key, 4)

    # gz / gz_prime: generator outputs, NCHW (batch=2, channels=4, spatial=16x16)
    # z / z_prime:   latent codes, (batch=2, hidden=32)
    gz = jax.random.normal(k1, (2, 4, 16, 16), dtype=jnp.float32)
    gz_prime = gz + 0.1 * jax.random.normal(k2, (2, 4, 16, 16), dtype=jnp.float32)
    z = jax.random.normal(k3, (2, 32), dtype=jnp.float32)
    z_prime = z + 0.01 * jax.random.normal(k4, (2, 32), dtype=jnp.float32)

    loss_fn = jax.jit(jacobian_clamping_loss)
    loss = jax.block_until_ready(loss_fn(gz, gz_prime, z, z_prime))

    ref = jax.block_until_ready(_reference_loss(gz, gz_prime, z, z_prime))
    assert jnp.allclose(loss, ref, rtol=1e-5, atol=1e-5), (loss, ref)

    print("KERNEL_OK")
</pallas_src>

<mosaic_0001>
module attributes {stable_mosaic.version = 11 : i64} {
  func.func @_ssd_kernel(%arg0: i32, %arg1: i32, %arg2: memref<16x128xf32, #tpu.memory_space<vmem>>, %arg3: memref<16x128xf32, #tpu.memory_space<vmem>>, %arg4: memref<1x8x128xf32, #tpu.memory_space<vmem>>) attributes {dimension_semantics = [#tpu.dimension_semantics<parallel>, #tpu.dimension_semantics<arbitrary>], iteration_bounds = array<i64: 1, 1>, scalar_prefetch = 0 : i64, scratch_operands = 0 : i64, tpu.core_type = #tpu.core_type<tc>, window_params = [{transform_indices = @transform_0, window_bounds = array<i64: 16, 128>}, {transform_indices = @transform_1, window_bounds = array<i64: 16, 128>}, {transform_indices = @transform_2, window_bounds = array<i64: 1, 8, 128>}]} {
    %c0_i32 = arith.constant 0 : i32
    %0 = arith.cmpi eq, %arg1, %c0_i32 : i32
    %1 = arith.extui %0 : i1 to i32
    %c0_i32_0 = arith.constant 0 : i32
    %2 = arith.cmpi ne, %1, %c0_i32_0 : i32
    scf.if %2 {
      %cst_11 = arith.constant 0.000000e+00 : f32
      %15 = vector.broadcast %cst_11 : f32 to vector<1x8x128xf32>
      %c0_12 = arith.constant 0 : index
      %c0_13 = arith.constant 0 : index
      %c0_14 = arith.constant 0 : index
      %16 = vector.load %arg4[%c0_12, %c0_13, %c0_14] : memref<1x8x128xf32, #tpu.memory_space<vmem>>, vector<1x8x128xf32>
      tpu.vector_store %arg4[%c0_12, %c0_13, %c0_14], %15 {strides = array<i32>} : memref<1x8x128xf32, #tpu.memory_space<vmem>>, vector<1x8x128xf32>,
    } else {
    }
    %cst = arith.constant 0.000000e+00 : f32
    %3 = vector.broadcast %cst : f32 to vector<8x128xf32>
    %c0 = arith.constant 0 : index
    %c0_1 = arith.constant 0 : index
    %4 = vector.load %arg2[%c0, %c0_1] : memref<16x128xf32, #tpu.memory_space<vmem>>, vector<16x128xf32>
    %c0_2 = arith.constant 0 : index
    %c0_3 = arith.constant 0 : index
    %5 = vector.load %arg3[%c0_2, %c0_3] : memref<16x128xf32, #tpu.memory_space<vmem>>, vector<16x128xf32>
    %6 = arith.subf %4, %5 : vector<16x128xf32>
    %7 = arith.mulf %6, %6 : vector<16x128xf32>
    %8 = vector.shape_cast %7 : vector<16x128xf32> to vector<2x8x128xf32>
    %cst_4 = arith.constant dense<0.000000e+00> : vector<8x128xf32>
    %9 = vector.multi_reduction <add>, %8, %cst_4 [0] : vector<2x8x128xf32> to vector<8x128xf32>
    %10 = arith.addf %3, %9 : vector<8x128xf32>
    %c0_5 = arith.constant 0 : index
    %c0_6 = arith.constant 0 : index
    %c0_7 = arith.constant 0 : index
    %11 = vector.load %arg4[%c0_5, %c0_6, %c0_7] : memref<1x8x128xf32, #tpu.memory_space<vmem>>, vector<1x8x128xf32>
    %12 = vector.shape_cast %10 : vector<8x128xf32> to vector<1x8x128xf32>
    %13 = arith.addf %11, %12 : vector<1x8x128xf32>
    %c0_8 = arith.constant 0 : index
    %c0_9 = arith.constant 0 : index
    %c0_10 = arith.constant 0 : index
    %14 = vector.load %arg4[%c0_8, %c0_9, %c0_10] : memref<1x8x128xf32, #tpu.memory_space<vmem>>, vector<1x8x128xf32>
    tpu.vector_store %arg4[%c0_8, %c0_9, %c0_10], %13 {strides = array<i32>} : memref<1x8x128xf32, #tpu.memory_space<vmem>>, vector<1x8x128xf32>,
    return
  }
  func.func @transform_0(%arg0: i32, %arg1: i32) -> (i32, i32) {
    %c1_i32 = arith.constant 1 : i32
    %0 = arith.muli %arg0, %c1_i32 : i32
    %1 = arith.addi %0, %arg1 : i32
    %c0_i32 = arith.constant 0 : i32
    %2 = arith.minsi %1, %c0_i32 : i32
    %c0_i32_0 = arith.constant 0 : i32
    %c0_i32_1 = arith.constant 0 : i32
    return %2, %c0_i32_0 : i32, i32
  }
  func.func @transform_1(%arg0: i32, %arg1: i32) -> (i32, i32) {
    %c1_i32 = arith.constant 1 : i32
    %0 = arith.muli %arg0, %c1_i32 : i32
    %1 = arith.addi %0, %arg1 : i32
    %c0_i32 = arith.constant 0 : i32
    %2 = arith.minsi %1, %c0_i32 : i32
    %c0_i32_0 = arith.constant 0 : i32
    %c0_i32_1 = arith.constant 0 : i32
    return %2, %c0_i32_0 : i32, i32
  }
  func.func @transform_2(%arg0: i32, %arg1: i32) -> (i32, i32, i32) {
    %c0_i32 = arith.constant 0 : i32
    %c0_i32_0 = arith.constant 0 : i32
    %c0_i32_1 = arith.constant 0 : i32
    return %arg0, %c0_i32, %c0_i32_0 : i32, i32, i32
  }
}

</mosaic_0001>

<bundles_post_ra>
// kernel: jacobian_clamping_loss.1
= control target key start
LH: loop header
LB: loop body
LE: loop exit
PB: predicated region body
PF: predicated region fallthrough
CT: control target
= control target key end

     0   :  { %s140_s0 = inlined_call_operand.vmem [shape: f32[16,128], index: 0, kind: input, shape index: {}]   ;;  %s141_s1 = inlined_call_operand.vmem [shape: f32[16,128], index: 1, kind: input, shape index: {}]   ;;  %s142_s2 = inlined_call_operand.vmem [shape: f32[1,8,128], index: 2, kind: output, shape index: {}]  }
   0x1   :  { %v80_v0 = vld [vmem:[%s140_s0] sm:$0xff]  ;;  %v81_v1 = vld [vmem:[%s140_s0 + $0x8] sm:$0xff] }
   0x2   :  { %v82_v2 = vld [vmem:[%s141_s1] sm:$0xff]  ;;  %v83_v3 = vld [vmem:[%s141_s1 + $0x8] sm:$0xff] }
   0x3   :  { %v84_v4 = vsub.f32 %v80_v0, %v82_v2  ;;  %v85_v5 = vsub.f32 %v81_v1, %v83_v3 }
   0x5   :  { %v86_v6 = vmul.f32 %v84_v4, %v84_v4  ;;  %v87_v7 = vmul.f32 %v85_v5, %v85_v5 }
   0x7   :  { %v88_v8 = vadd.f32 %v87_v7, %v86_v6 }
   0x9   :  { %92 = vst [vmem:[%s142_s2] sm:$0xff] %v88_v8 }

</bundles_post_ra>
